<compile_context>
chip_gen: v6e
topology: v6e:2x2x1
jax: 0.10.0
libtpu: 0.0.40
codegen_flags: <defaults>
</compile_context>

<pallas_src>
import jax
import jax.numpy as jnp
from jax.experimental import pallas as pl
from jax.experimental.pallas import tpu as pltpu

_LANE = 128
_SUBLANE = 8


def _round_up(x, m):
    return ((x + m - 1) // m) * m


def _nbytes(a):
    return int(a.size) * jnp.dtype(a.dtype).itemsize


def mlp_kernel(x_ref, w1_ref, b1_ref, w2_ref, b2_ref, o_ref):
    # Cast x to the matmul operand dtype inside the kernel (free VPU op hidden
    # under the MXU; avoids a separate wrapper-side XLA cast pass over HBM).
    x = x_ref[...].astype(w1_ref.dtype)
    # fc1 on the MXU, f32 accumulation.
    h = jnp.dot(x, w1_ref[...], preferred_element_type=jnp.float32)
    # Bias + ReLU on the f32 accumulator (v5e VPU has no bf16 path).
    h = jnp.maximum(h + b1_ref[...], 0.0)
    # fc2: cast the activation to the matmul operand dtype, accumulate in f32.
    y = jnp.dot(h.astype(w2_ref.dtype), w2_ref[...],
                preferred_element_type=jnp.float32)
    o_ref[...] = (y + b2_ref[...]).astype(o_ref.dtype)


def prepare_params(w1, b1, w2, b2, *, matmul_dtype=jnp.bfloat16):
    """One-time parameter preparation (do NOT call per forward).

    * Pads hidden and output features to multiples of 128 lanes so every tile
      in the kernel is lane-dense. Zero-padding is exact: padded hidden units
      compute relu(0 + 0) = 0 and the matching zero rows of W2 contribute 0.
    * Casts weight matrices to the MXU operand dtype exactly once (bf16 by
      default: native MXU rate on all three generations, half the HBM bytes).
    * Keeps biases as f32 rows so bias-add / ReLU act on the f32 accumulator.
    """
    in_size, hidden = w1.shape
    hidden2, out_size = w2.shape
    assert hidden == hidden2 and b1.shape == (hidden,) and b2.shape == (out_size,)

    hid_pad = _round_up(hidden, _LANE)
    out_pad = _round_up(out_size, _LANE)
    if hid_pad != hidden:
        w1 = jnp.pad(w1, ((0, 0), (0, hid_pad - hidden)))
        b1 = jnp.pad(b1, (0, hid_pad - hidden))
        w2 = jnp.pad(w2, ((0, hid_pad - hidden), (0, 0)))
    if out_pad != out_size:
        w2 = jnp.pad(w2, ((0, 0), (0, out_pad - out_size)))
        b2 = jnp.pad(b2, (0, out_pad - out_size))

    return dict(
        w1=w1.astype(matmul_dtype),
        b1=b1.reshape(1, hid_pad).astype(jnp.float32),
        w2=w2.astype(matmul_dtype),
        b2=b2.reshape(1, out_pad).astype(jnp.float32),
        in_size=in_size,
        out_size=out_size,
    )


def _vmem_budget_bytes():
    """Generation-aware usable VMEM with headroom below physical capacity."""
    try:
        phys = int(pltpu.get_tpu_info().vmem_capacity_bytes)
    except Exception:
        phys = 64 << 20  # conservative fallback: v7x physical VMEM per TC
    budget = min(phys - (8 << 20), (phys * 7) // 8)   # leave headroom
    return max(budget, 16 << 20)


def simple_nn_forward(x, params, *, block_b=None, x_buffering=2):
    """x: (B, in_size). `params` comes from prepare_params (called once)."""
    w1, b1_row = params["w1"], params["b1"]
    w2, b2_row = params["w2"], params["b2"]
    in_size, out_size = params["in_size"], params["out_size"]
    hid_pad = w1.shape[1]
    out_pad = w2.shape[1]

    B = x.shape[0]
    assert x.shape[1] == in_size
    out_dtype = x.dtype
    x_itemsize = jnp.dtype(x.dtype).itemsize
    out_itemsize = jnp.dtype(out_dtype).itemsize

    # ---- VMEM budget: weights are grid-invariant (single-buffered); x / out
    # ---- tiles are pipelined; f32 hidden intermediate also lives in VMEM. ---
    weights_vmem = (_nbytes(w1) + _nbytes(w2) + _nbytes(b1_row) + _nbytes(b2_row))
    vmem_budget = _vmem_budget_bytes()
    avail = vmem_budget - weights_vmem - (2 << 20)
    if avail <= 0:
        # TODO(synk): when the resident weights alone exceed the VMEM budget,
        # add a hidden/out tiling grid axis (reduction axis last, marked
        # "arbitrary", accumulator init/finalize via pl.when) instead of
        # keeping both weight matrices fully resident.
        raise ValueError("Weights do not fit in VMEM; add a K/N tiling axis.")
    per_row_bytes = (x_buffering * in_size * x_itemsize   # pipelined x blocks
                     + 2 * out_pad * out_itemsize         # double-buffered out
                     + 6 * hid_pad)                       # f32 h + operand-dtype h
    max_block_b = max(_SUBLANE, (avail // per_row_bytes) // _SUBLANE * _SUBLANE)

    # ---- Batch tiling: single step for small batches, ~512-row tiles for ----
    # ---- large ones (VMEM permitting); rebalance to bound padding waste. ----
    B_min = _round_up(B, _SUBLANE)
    if block_b is None:
        block_b = B_min if B_min <= 1024 else 512
    block_b = min(block_b, max_block_b, B_min)        # auto-clamp block_b > B
    block_b = max(_SUBLANE, _round_up(block_b, _SUBLANE))
    n_steps = -(-B_min // block_b)
    # Rebalance: with e.g. B=300 and block_b=256 a fixed tile would pad to 512
    # rows (~70% waste); recomputing the tile keeps waste < 1 sublane group.
    block_b = _round_up(-(-B_min // n_steps), _SUBLANE)
    B_pad = n_steps * block_b
    if B_pad != B:
        x = jnp.pad(x, ((0, B_pad - B), (0, 0)))

    grid = (B_pad // block_b,)

    # ---- Scheduling hints: cost estimate + explicit VMEM budget. ------------
    flops = 2 * B_pad * (in_size * hid_pad + hid_pad * out_pad)
    bytes_accessed = (_nbytes(x) + weights_vmem + B_pad * out_pad * out_itemsize)

    x_blk = block_b * in_size * x_itemsize
    o_blk = block_b * out_pad * out_itemsize
    vmem_limit = (weights_vmem + x_buffering * x_blk + 2 * o_blk
                  + block_b * 6 * hid_pad + (2 << 20))
    vmem_limit = int(min(max(vmem_limit, 8 << 20), vmem_budget))

    resident = dict(pipeline_mode=pl.Buffered(1))   # grid-invariant operands
    x_kwargs = {} if x_buffering == 2 else dict(pipeline_mode=pl.Buffered(x_buffering))

    out_padded = pl.pallas_call(
        mlp_kernel,
        out_shape=jax.ShapeDtypeStruct((B_pad, out_pad), out_dtype),
        grid_spec=pl.GridSpec(
            grid=grid,
            in_specs=[
                pl.BlockSpec((block_b, in_size), lambda i: (i, 0), **x_kwargs),
                pl.BlockSpec((in_size, hid_pad), lambda i: (0, 0), **resident),
                pl.BlockSpec((1, hid_pad), lambda i: (0, 0), **resident),
                pl.BlockSpec((hid_pad, out_pad), lambda i: (0, 0), **resident),
                pl.BlockSpec((1, out_pad), lambda i: (0, 0), **resident),
            ],
            out_specs=pl.BlockSpec((block_b, out_pad), lambda i: (i, 0)),
        ),
        compiler_params=pltpu.CompilerParams(
            dimension_semantics=("parallel",),
            vmem_limit_bytes=vmem_limit,
        ),
        cost_estimate=pl.CostEstimate(
            flops=int(flops), transcendentals=0,
            bytes_accessed=int(bytes_accessed)),
    )(x, w1, b1_row, w2, b2_row)

    return out_padded[:B, :out_size]


if __name__ == "__main__":
    # SimpleNN(input_size=16, hidden_size=32, output_size=8)
    input_size, hidden_size, output_size = 16, 32, 8
    batch = 48

    key = jax.random.PRNGKey(0)
    kx, k1, k2, k3, k4 = jax.random.split(key, 5)

    x = jax.random.normal(kx, (batch, input_size), dtype=jnp.float32)
    # Deterministic synthetic parameters, stored pre-transposed (in, out).
    w1 = jax.random.normal(k1, (input_size, hidden_size), dtype=jnp.float32) * 0.1
    b1 = jax.random.normal(k2, (hidden_size,), dtype=jnp.float32) * 0.1
    w2 = jax.random.normal(k3, (hidden_size, output_size), dtype=jnp.float32) * 0.1
    b2 = jax.random.normal(k4, (output_size,), dtype=jnp.float32) * 0.1

    # Pure-JAX reference.
    ref = jnp.maximum(x @ w1 + b1, 0.0) @ w2 + b2

    # f32 matmul operands (tight tolerance); toy size -> single grid step.
    params_f32 = prepare_params(w1, b1, w2, b2, matmul_dtype=jnp.float32)
    out = simple_nn_forward(x, params_f32)
    jax.block_until_ready(out)
    assert out.shape == (batch, output_size)
    assert jnp.allclose(out, ref, atol=1e-5, rtol=1e-5)

    # Default path: bf16 weights cast ONCE in prepare_params, f32 accumulation.
    params_bf16 = prepare_params(w1, b1, w2, b2)
    out_bf16 = simple_nn_forward(x, params_bf16)
    jax.block_until_ready(out_bf16)
    assert out_bf16.shape == (batch, output_size)
    assert jnp.allclose(out_bf16, ref, atol=5e-2, rtol=5e-2)

    # Ragged batch exercises the per-call x-padding path.
    out_r = simple_nn_forward(x[:10], params_f32)
    jax.block_until_ready(out_r)
    assert out_r.shape == (10, output_size)
    assert jnp.allclose(out_r, ref[:10], atol=1e-5, rtol=1e-5)

    # Forced small tile exercises the multi-step pipelined grid + rebalancing.
    out_t = simple_nn_forward(x, params_f32, block_b=16)
    jax.block_until_ready(out_t)
    assert jnp.allclose(out_t, ref, atol=1e-5, rtol=1e-5)

    print("KERNEL_OK")
</pallas_src>

<mosaic_0001>
module attributes {stable_mosaic.version = 11 : i64} {
  func.func @mlp_kernel(%arg0: i32, %arg1: memref<48x16xf32, #tpu.memory_space<vmem>>, %arg2: memref<16x128xf32, #tpu.memory_space<vmem>>, %arg3: memref<1x128xf32, #tpu.memory_space<vmem>>, %arg4: memref<128x128xf32, #tpu.memory_space<vmem>>, %arg5: memref<1x128xf32, #tpu.memory_space<vmem>>, %arg6: memref<48x128xf32, #tpu.memory_space<vmem>>) attributes {dimension_semantics = [#tpu.dimension_semantics<parallel>], iteration_bounds = array<i64: 1>, scalar_prefetch = 0 : i64, scratch_operands = 0 : i64, tpu.core_type = #tpu.core_type<tc>, window_params = [{transform_indices = @transform_0, window_bounds = array<i64: 48, 16>}, {pipeline_mode = #tpu.pipeline_mode<synchronous>, transform_indices = @transform_1, window_bounds = array<i64: 16, 128>}, {pipeline_mode = #tpu.pipeline_mode<synchronous>, transform_indices = @transform_2, window_bounds = array<i64: 1, 128>}, {pipeline_mode = #tpu.pipeline_mode<synchronous>, transform_indices = @transform_3, window_bounds = array<i64: 128, 128>}, {pipeline_mode = #tpu.pipeline_mode<synchronous>, transform_indices = @transform_4, window_bounds = array<i64: 1, 128>}, {transform_indices = @transform_5, window_bounds = array<i64: 48, 128>}]} {
    %c0 = arith.constant 0 : index
    %c0_0 = arith.constant 0 : index
    %0 = vector.load %arg1[%c0, %c0_0] : memref<48x16xf32, #tpu.memory_space<vmem>>, vector<48x16xf32>
    %c0_1 = arith.constant 0 : index
    %c0_2 = arith.constant 0 : index
    %1 = vector.load %arg2[%c0_1, %c0_2] : memref<16x128xf32, #tpu.memory_space<vmem>>, vector<16x128xf32>
    %cst = arith.constant dense<0.000000e+00> : vector<48x128xf32>
    %2 = tpu.matmul %0, %1, %cst {dimension_numbers = #tpu.dot_dimension_numbers<[1], [0], [0], [1], [0, 0, 1, 1], [], []>} : vector<48x16xf32>, vector<16x128xf32>, vector<48x128xf32> -> vector<48x128xf32>
    %c0_3 = arith.constant 0 : index
    %c0_4 = arith.constant 0 : index
    %3 = vector.load %arg3[%c0_3, %c0_4] : memref<1x128xf32, #tpu.memory_space<vmem>>, vector<1x128xf32>
    %4 = vector.broadcast %3 : vector<1x128xf32> to vector<48x128xf32>
    %5 = arith.addf %2, %4 : vector<48x128xf32>
    %cst_5 = arith.constant 0.000000e+00 : f32
    %6 = vector.broadcast %cst_5 : f32 to vector<48x128xf32>
    %7 = arith.maximumf %5, %6 : vector<48x128xf32>
    %c0_6 = arith.constant 0 : index
    %c0_7 = arith.constant 0 : index
    %8 = vector.load %arg4[%c0_6, %c0_7] : memref<128x128xf32, #tpu.memory_space<vmem>>, vector<128x128xf32>
    %cst_8 = arith.constant dense<0.000000e+00> : vector<48x128xf32>
    %9 = tpu.matmul %7, %8, %cst_8 {dimension_numbers = #tpu.dot_dimension_numbers<[1], [0], [0], [1], [0, 0, 1, 1], [], []>} : vector<48x128xf32>, vector<128x128xf32>, vector<48x128xf32> -> vector<48x128xf32>
    %c0_9 = arith.constant 0 : index
    %c0_10 = arith.constant 0 : index
    %10 = vector.load %arg5[%c0_9, %c0_10] : memref<1x128xf32, #tpu.memory_space<vmem>>, vector<1x128xf32>
    %11 = vector.broadcast %10 : vector<1x128xf32> to vector<48x128xf32>
    %12 = arith.addf %9, %11 : vector<48x128xf32>
    %c0_11 = arith.constant 0 : index
    %c0_12 = arith.constant 0 : index
    %13 = vector.load %arg6[%c0_11, %c0_12] : memref<48x128xf32, #tpu.memory_space<vmem>>, vector<48x128xf32>
    tpu.vector_store %arg6[%c0_11, %c0_12], %12 {strides = array<i32>} : memref<48x128xf32, #tpu.memory_space<vmem>>, vector<48x128xf32>,
    return
  }
  func.func @transform_0(%arg0: i32) -> (i32, i32) {
    %c0_i32 = arith.constant 0 : i32
    %c0_i32_0 = arith.constant 0 : i32
    return %arg0, %c0_i32 : i32, i32
  }
  func.func @transform_1(%arg0: i32) -> (i32, i32) {
    %c0_i32 = arith.constant 0 : i32
    %c0_i32_0 = arith.constant 0 : i32
    %c0_i32_1 = arith.constant 0 : i32
    return %c0_i32, %c0_i32_0 : i32, i32
  }
  func.func @transform_2(%arg0: i32) -> (i32, i32) {
    %c0_i32 = arith.constant 0 : i32
    %c0_i32_0 = arith.constant 0 : i32
    %c0_i32_1 = arith.constant 0 : i32
    return %c0_i32, %c0_i32_0 : i32, i32
  }
  func.func @transform_3(%arg0: i32) -> (i32, i32) {
    %c0_i32 = arith.constant 0 : i32
    %c0_i32_0 = arith.constant 0 : i32
    %c0_i32_1 = arith.constant 0 : i32
    return %c0_i32, %c0_i32_0 : i32, i32
  }
  func.func @transform_4(%arg0: i32) -> (i32, i32) {
    %c0_i32 = arith.constant 0 : i32
    %c0_i32_0 = arith.constant 0 : i32
    %c0_i32_1 = arith.constant 0 : i32
    return %c0_i32, %c0_i32_0 : i32, i32
  }
  func.func @transform_5(%arg0: i32) -> (i32, i32) {
    %c0_i32 = arith.constant 0 : i32
    %c0_i32_0 = arith.constant 0 : i32
    return %arg0, %c0_i32 : i32, i32
  }
}

</mosaic_0001>

<bundles_post_ra>
// kernel: tpu_custom_call.1
= control target key start
LH: loop header
LB: loop body
LE: loop exit
PB: predicated region body
PF: predicated region fallthrough
CT: control target
= control target key end

     0   :  { %10 = vsyncpa [#allocation3], 0  ;;  %s565_s0 = inlined_call_operand.vmem [shape: f32[48,16], index: 0, kind: input, shape index: {}]   ;;  %s566_s1 = inlined_call_operand.vmem [shape: f32[16,128], index: 1, kind: input, shape index: {}]   ;;  %s567_s2 = inlined_call_operand.vmem [shape: f32[1,128], index: 2, kind: input, shape index: {}]   ;;  %s568_s3 = inlined_call_operand.hbm [shape: f32[128,128], index: 3, kind: input, shape index: {}]   ;;  %s569_s4 = inlined_call_operand.vmem [shape: f32[1,128], index: 4, kind: input, shape index: {}]   ;;  %s570_s5 = inlined_call_operand.hbm [shape: f32[48,128], index: 5, kind: output, shape index: {}]  }
   0x1   :  { %11 = vsyncpa [#allocation4], 0  ;;  %s483_s18 = smov [#allocation2]  }
   0x2   :  { %s23_s19 = sshll.u32 %s483_s18, 4  ;;  %s24_s19 = int_to_ptr.vmem [resolvable:$true] %s23_s19 }
   0x3   :  { %s447_s20 = scalar_lea.vmem %s24_s19, 2048  ;;  %p452_p1 = scmp.lt.s32.totalorder %s24_s19, %s24_s19 }
   0x4   :  { %p448_p0 = scmp.ne.s32.totalorder %s24_s19, %s447_s20  ;;  %p453_p2 = scmp.lt.s32.totalorder %s447_s20, %s447_s20 }
   0x6   :  { %p454_p3 = por %p453_p2, %p452_p1 }
   0x8   :  { %p455_p4 = pnand %p454_p3, %p448_p0 }
   0xa   :  { %458 = shalt.err (!%p455_p4)
}
   0xb   :  { %s484_s21 = smov 128   ;;  %s485_s22 = smov 8  }
   0xc   :  { %29 = dma.hbm_to_vmem [thread:$0]  %s568_s3, 2048, %s24_s19, [#allocation3], %s484_s21, %s484_s21, %s485_s22  }
   0xd   :  { %479 = dma.done.wait [#allocation3], 2048  }
   0xe   :  { %480 = vsyncadd [#allocation3], 4294965248  ;;  %vm50_vm0 = vcmask 130048   ;;  %v42_v0 = vld [vmem:[%s566_s1 + $0x8] sm:$0xff]  ;;  %v41_v1 = vld [vmem:[%s566_s1] sm:$0xff]  ;;  %s486_s16 = smov [#allocation5]  }
   0xf   :  { %v35_v2 = vld [vmem:[%s565_s0] sm:$0xff]  ;;  %349 = vmatprep.subr.mxu0 %v42_v0  ;;  %v36_v3 = vld [vmem:[%s565_s0 + $0x8] sm:$0xff]  ;;  %v185_v4 = vld [vmem:[#allocation2 + $0x78] sm:$0xff]  ;;  %s299_s17 = sshll.u32 %s486_s16, 4  ;;  %s300_s17 = int_to_ptr.vmem [resolvable:$true] %s299_s17 }
  0x10   :  { %353 = vmatprep.mubr.msk.f32.mxu0 %vm50_vm0, %v35_v2  ;;  %350 = vmatpush3.msra.mxu0 %v42_v0  ;;  %v37_v5 = vld [vmem:[%s565_s0 + $0x10] sm:$0xff]  ;;  %v38_v7 = vld [vmem:[%s565_s0 + $0x18] sm:$0xff]  ;;  %v183_v8 = vld [vmem:[#allocation2 + $0x68] sm:$0xff]  ;;  %p464_p6 = scmp.lt.s32.totalorder %s300_s17, %s300_s17 }
  0x11   :  { %351 = vmatprep.subr.mxu0 %v41_v1  ;;  %403 = vmatprep.subr.mxu1 %v185_v4  ;;  %v184_v6 = vld [vmem:[#allocation2 + $0x70] sm:$0xff]  ;;  %v39_v9 = vld [vmem:[%s565_s0 + $0x20] sm:$0xff]  ;;  %v40_v11 = vld [vmem:[%s565_s0 + $0x28] sm:$0xff] }
  0x12   :  { %352 = vmatpush3.msra.mxu0 %v41_v1  ;;  %419 = vmatpush3.msra.mxu1 %v185_v4  ;;  %v182_v10 = vld [vmem:[#allocation2 + $0x60] sm:$0xff]  ;;  %v181_v12 = vld [vmem:[#allocation2 + $0x58] sm:$0xff]  ;;  %v180_v13 = vld [vmem:[#allocation2 + $0x50] sm:$0xff] }
  0x13   :  { %354 = vmatmul.mubr.msk.f32.vlgmr.msra.gmra.mxu0 %vm50_vm0, %v36_v3  ;;  %362 = vmatprep.subr.mxu0 %v185_v4  ;;  %v179_v14 = vld [vmem:[#allocation2 + $0x48] sm:$0xff]  ;;  %v178_v15 = vld [vmem:[#allocation2 + $0x40] sm:$0xff]  ;;  %v177_v16 = vld [vmem:[#allocation2 + $0x38] sm:$0xff] }
  0x14   :  { %356 = vmatprep.mubr.msk.f32.mxu0 %vm50_vm0, %v37_v5  ;;  %363 = vmatpush3.msra.mxu0 %v185_v4  ;;  %v176_v17 = vld [vmem:[#allocation2 + $0x30] sm:$0xff]  ;;  %v175_v18 = vld [vmem:[#allocation2 + $0x28] sm:$0xff]  ;;  %v174_v19 = vld [vmem:[#allocation2 + $0x20] sm:$0xff] }
  0x15   :  { %364 = vmatprep.subr.mxu0 %v184_v6  ;;  %404 = vmatprep.subr.mxu1 %v184_v6  ;;  %v173_v20 = vld [vmem:[#allocation2 + $0x18] sm:$0xff]  ;;  %v172_v21 = vld [vmem:[#allocation2 + $0x10] sm:$0xff]  ;;  %v171_v22 = vld [vmem:[#allocation2 + $0x8] sm:$0xff] }
  0x16   :  { %365 = vmatpush3.msra.mxu0 %v184_v6  ;;  %420 = vmatpush3.msra.mxu1 %v184_v6  ;;  %v170_v23 = vld [vmem:[#allocation2] sm:$0xff] }
  0x17   :  { %357 = vmatmul.mubr.msk.f32.gmra.mxu0 %vm50_vm0, %v38_v7  ;;  %366 = vmatprep.subr.mxu0 %v183_v8  ;;  %v311_v24 = vld [vmem:[%s567_s2] ss:$0 sm:$0xff] }
  0x18   :  { %359 = vmatprep.mubr.msk.f32.mxu0 %vm50_vm0, %v39_v9  ;;  %367 = vmatpush3.msra.mxu0 %v183_v8  ;;  %v318_v43 = vld [vmem:[%s569_s4] ss:$0 sm:$0xff]  ;;  %s459_s4 = scalar_lea.vmem %s300_s17, 768 }
  0x19   :  { %368 = vmatprep.subr.mxu0 %v182_v10  ;;  %405 = vmatprep.subr.mxu1 %v183_v8  ;;  %p460_p5 = scmp.ne.s32.totalorder %s300_s17, %s459_s4  ;;  %p465_p7 = scmp.lt.s32.totalorder %s459_s4, %s459_s4 }
  0x1a   :  { %369 = vmatpush3.msra.mxu0 %v182_v10  ;;  %421 = vmatpush3.msra.mxu1 %v183_v8 }
  0x1b   :  { %360 = vmatmul.mubr.msk.f32.gmra.mxu0 %vm50_vm0, %v40_v11  ;;  %370 = vmatprep.subr.mxu0 %v181_v12  ;;  %p466_p8 = por %p465_p7, %p464_p6 }
  0x1c   :  { %371 = vmatpush3.msra.mxu0 %v181_v12  ;;  %406 = vmatprep.subr.mxu1 %v182_v10 }
  0x1d   :  { %372 = vmatprep.subr.mxu0 %v180_v13  ;;  %422 = vmatpush3.msra.mxu1 %v182_v10  ;;  %p467_p9 = pnand %p466_p8, %p460_p5 }
  0x1e   :  { %373 = vmatpush3.msra.mxu0 %v180_v13  ;;  %407 = vmatprep.subr.mxu1 %v181_v12 }
  0x1f   :  { %374 = vmatprep.subr.mxu0 %v179_v14  ;;  %423 = vmatpush3.msra.mxu1 %v181_v12 }
  0x20   :  { %375 = vmatpush3.msra.mxu0 %v179_v14  ;;  %408 = vmatprep.subr.mxu1 %v180_v13 }
  0x21   :  { %376 = vmatprep.subr.mxu0 %v178_v15  ;;  %424 = vmatpush3.msra.mxu1 %v180_v13 }
  0x22   :  { %377 = vmatpush3.msra.mxu0 %v178_v15  ;;  %409 = vmatprep.subr.mxu1 %v179_v14 }
  0x23   :  { %378 = vmatprep.subr.mxu0 %v177_v16  ;;  %425 = vmatpush3.msra.mxu1 %v179_v14 }
  0x24   :  { %379 = vmatpush3.msra.mxu0 %v177_v16  ;;  %410 = vmatprep.subr.mxu1 %v178_v15 }
  0x25   :  { %380 = vmatprep.subr.mxu0 %v176_v17  ;;  %426 = vmatpush3.msra.mxu1 %v178_v15 }
  0x26   :  { %381 = vmatpush3.msra.mxu0 %v176_v17  ;;  %411 = vmatprep.subr.mxu1 %v177_v16 }
  0x27   :  { %382 = vmatprep.subr.mxu0 %v175_v18  ;;  %427 = vmatpush3.msra.mxu1 %v177_v16 }
  0x28   :  { %383 = vmatpush3.msra.mxu0 %v175_v18  ;;  %412 = vmatprep.subr.mxu1 %v176_v17 }
  0x29   :  { %384 = vmatprep.subr.mxu0 %v174_v19  ;;  %428 = vmatpush3.msra.mxu1 %v176_v17 }
  0x2a   :  { %385 = vmatpush3.msra.mxu0 %v174_v19  ;;  %413 = vmatprep.subr.mxu1 %v175_v18 }
  0x2b   :  { %429 = vmatpush3.msra.mxu1 %v175_v18  ;;  %386 = vmatprep.subr.mxu0 %v173_v20 }
  0x2c   :  { %414 = vmatprep.subr.mxu1 %v174_v19  ;;  %387 = vmatpush3.msra.mxu0 %v173_v20 }
  0x2d   :  { %430 = vmatpush3.msra.mxu1 %v174_v19  ;;  %388 = vmatprep.subr.mxu0 %v172_v21 }
  0x2e   :  { %415 = vmatprep.subr.mxu1 %v173_v20  ;;  %389 = vmatpush3.msra.mxu0 %v172_v21 }
  0x2f   :  { %431 = vmatpush3.msra.mxu1 %v173_v20  ;;  %390 = vmatprep.subr.mxu0 %v171_v22 }
  0x30   :  { %416 = vmatprep.subr.mxu1 %v172_v21  ;;  %391 = vmatpush3.msra.mxu0 %v171_v22 }
  0x31   :  { %432 = vmatpush3.msra.mxu1 %v172_v21  ;;  %392 = vmatprep.subr.mxu0 %v170_v23 }
  0x32   :  { %417 = vmatprep.subr.mxu1 %v171_v22  ;;  %393 = vmatpush3.msra.mxu0 %v170_v23 }
  0x33   :  { %433 = vmatpush3.msra.mxu1 %v171_v22 }
  0x34   :  { %418 = vmatprep.subr.mxu1 %v170_v23 }
  0x35   :  { %434 = vmatpush3.msra.mxu1 %v170_v23 }
  0xd3   :  { %v355_v25 = vpop.f32.mrf.mxu0 }
  0xd4   :  { %v141_v26 = vadd.f32 %v355_v25, %v311_v24 }
  0xd5   :  { %v135_v27 = vpop.f32.mrf.mxu0 }
  0xd6   :  { %v136_v28 = vadd.f32 %v311_v24, %v135_v27  ;;  %v165_v31 = vmax.f32 %v141_v26, 0.0 }
  0xd7   :  { %v358_v29 = vpop.f32.mrf.mxu0 }
  0xd8   :  { %v164_v30 = vmax.f32 %v136_v28, 0.0  ;;  %v151_v32 = vadd.f32 %v358_v29, %v311_v24 }
  0xd9   :  { %v145_v33 = vpop.f32.mrf.mxu0 }
  0xda   :  { %394 = vmatprep.mubr.f32.mxu0 %v164_v30  ;;  %v146_v34 = vadd.f32 %v311_v24, %v145_v33  ;;  %v167_v37 = vmax.f32 %v151_v32, 0.0 }
  0xdb   :  { %v361_v35 = vpop.f32.mrf.mxu0  ;;  %395 = vmatmul.mubr.f32.vlgmr.msra.gmra.mxu0 %v165_v31 }
  0xdc   :  { %v166_v36 = vmax.f32 %v146_v34, 0.0  ;;  %v161_v38 = vadd.f32 %v361_v35, %v311_v24 }
  0xdd   :  { %v155_v39 = vpop.f32.mrf.mxu0 }
  0xde   :  { %v156_v40 = vadd.f32 %v311_v24, %v155_v39  ;;  %397 = vmatprep.mubr.f32.mxu1 %v166_v36  ;;  %v169_v42 = vmax.f32 %v161_v38, 0.0 }
  0xdf   :  { %398 = vmatmul.mubr.f32.vlgmr.msra.gmra.mxu1 %v167_v37 }
  0xe0   :  { %v168_v41 = vmax.f32 %v156_v40, 0.0 }
  0xe2   :  { %400 = vmatprep.mubr.f32.mxu1 %v168_v41 }
  0xe3   :  { %401 = vmatmul.mubr.f32.gmra.mxu1 %v169_v42 }
 0x19b   :  { %v396_v44 = vpop.f32.mrf.mxu0 }
 0x19c   :  { %v265_v45 = vadd.f32 %v396_v44, %v318_v43 }
 0x19d   :  { %v259_v46 = vpop.f32.mrf.mxu0 }
 0x19e   :  { %289 = vst [vmem:[#allocation5 + $0x8] sm:$0xff] %v265_v45  ;;  %v260_v47 = vadd.f32 %v318_v43, %v259_v46 }
 0x19f   :  { %v399_v48 = vpop.f32.mrf.mxu1 }
 0x1a0   :  { %288 = vst [vmem:[#allocation5] sm:$0xff] %v260_v47  ;;  %v275_v49 = vadd.f32 %v399_v48, %v318_v43 }
 0x1a1   :  { %v269_v50 = vpop.f32.mrf.mxu1 }
 0x1a2   :  { %291 = vst [vmem:[#allocation5 + $0x18] sm:$0xff] %v275_v49  ;;  %v270_v51 = vadd.f32 %v318_v43, %v269_v50 }
 0x1a3   :  { %v402_v52 = vpop.f32.mrf.mxu1 }
 0x1a4   :  { %290 = vst [vmem:[#allocation5 + $0x10] sm:$0xff] %v270_v51  ;;  %v285_v53 = vadd.f32 %v402_v52, %v318_v43 }
 0x1a5   :  { %v279_v54 = vpop.f32.mrf.mxu1 }
 0x1a6   :  { %293 = vst [vmem:[#allocation5 + $0x28] sm:$0xff] %v285_v53  ;;  %v280_v55 = vadd.f32 %v318_v43, %v279_v54 }
 0x1a8   :  { %292 = vst [vmem:[#allocation5 + $0x20] sm:$0xff] %v280_v55 }
 0x1a9   :  { %470 = shalt.err (!%p467_p9)
}
 0x1aa   :  { %305 = dma.vmem_to_hbm [thread:$0]  %s300_s17, 768, %s570_s5, [#allocation4], %s484_s21, %s484_s21, %s485_s22  }
 0x1ab   :  { %481 = dma.done.wait [#allocation4], 768  }
 0x1ac   :  { %482 = vsyncadd [#allocation4], 4294966528 }
 0x1ad   :  { %309 = vsyncpa [#allocation3], 1 }
 0x1ae   :  { %310 = vsyncpa [#allocation4], 1 }

</bundles_post_ra>
